<compile_context>
chip_gen: v7x
topology: tpu7x:2x2x1
jax: 0.10.0
libtpu: 0.0.40
codegen_flags: <defaults>
</compile_context>

<pallas_src>
import functools

import jax
import jax.numpy as jnp
from jax.experimental import pallas as pl
from jax.experimental.pallas import tpu as pltpu


def _combine_kernel(nodes_ref, adj_ref, feat_ref, w_self_ref, w_neigh_ref,
                    b_ref, o_ref, *, negative_slope, eps):
    # nodes_ref:  [TM, 1] int32          adj_ref:    [TM, num_nodes] f32
    # feat_ref:   [num_nodes, D_in] f32  w_*_ref:    [D_in, D_out_pad] f32
    # b_ref:      [1, D_out_pad] f32     o_ref:      [TM, D_out_pad] f32
    feat = feat_ref[...]
    node_ids = nodes_ref[...]                       # [TM, 1] int32
    tm = node_ids.shape[0]
    num_nodes = feat.shape[0]

    # In-kernel embedding gather as a one-hot matmul on the (otherwise idle) MXU.
    cols = jax.lax.broadcasted_iota(jnp.int32, (tm, num_nodes), 1)
    sel = (node_ids == cols).astype(feat.dtype)     # [TM, num_nodes]
    self_feats = jnp.dot(sel, feat, preferred_element_type=jnp.float32)
    # Mean aggregation over neighbors (row-normalized dense adjacency).
    neigh_feats = jnp.dot(adj_ref[...], feat, preferred_element_type=jnp.float32)

    # cat([self, neigh]) @ w + b  ==  self @ w_self + neigh @ w_neigh + b
    out = (jnp.dot(self_feats, w_self_ref[...], preferred_element_type=jnp.float32)
           + jnp.dot(neigh_feats, w_neigh_ref[...], preferred_element_type=jnp.float32)
           + b_ref[...])

    # LeakyReLU(0.2)
    out = jnp.where(out > 0, out, negative_slope * out)

    # F.normalize: out / max(||out||, eps)  ==  out * rsqrt(max(sumsq, eps^2))
    sumsq = jnp.sum(out * out, axis=-1, keepdims=True)
    inv = jax.lax.rsqrt(jnp.maximum(sumsq, eps * eps))
    o_ref[...] = (out * inv).astype(o_ref.dtype)


def _round_up(x, m):
    return ((x + m - 1) // m) * m


def combine_forward(nodes, adj_norm, feat_table, w, b, *,
                    negative_slope=0.2, eps=1e-12, row_tile=256):
    """Fused GraphSage Combine forward (self_concat=True path).

    nodes:      [N] int32 node ids
    adj_norm:   [N, num_nodes] f32 row-normalized adjacency (mean aggregator)
    feat_table: [num_nodes, D_in] f32 embedding table
    w:          [2*D_in, D_out] f32,  b: [D_out] f32
    returns:    [N, D_out] f32
    """
    N = nodes.shape[0]
    num_nodes, d_in = feat_table.shape
    d_out = w.shape[1]
    assert w.shape[0] == 2 * d_in, "self_concat=True expects w of shape [2*D_in, D_out]"

    # Lane-dense output: zero-pad D_out up to a multiple of 128 (padded columns
    # of w/b are exactly zero -> padded output columns are zero -> row norm is
    # unchanged). Split w so the concat never materializes.
    d_out_p = _round_up(d_out, 128)
    w_p = jnp.zeros((2 * d_in, d_out_p), jnp.float32).at[:, :d_out].set(w)
    w_self = w_p[:d_in]
    w_neigh = w_p[d_in:]
    b_p = jnp.zeros((1, d_out_p), jnp.float32).at[:, :d_out].set(b.reshape(1, -1))

    # Row tiling: TM rows per grid step; feat_table / w / b stay resident.
    n_p = _round_up(N, 8)
    tm = min(n_p, row_tile)
    n_p = _round_up(n_p, tm)
    nodes2d = jnp.zeros((n_p, 1), jnp.int32).at[:N, 0].set(nodes.astype(jnp.int32))
    adj_p = jnp.zeros((n_p, num_nodes), jnp.float32).at[:N].set(adj_norm)

    kernel = functools.partial(
        _combine_kernel, negative_slope=negative_slope, eps=eps
    )

    out = pl.pallas_call(
        kernel,
        out_shape=jax.ShapeDtypeStruct((n_p, d_out_p), jnp.float32),
        grid_spec=pltpu.PrefetchScalarGridSpec(
            num_scalar_prefetch=0,
            grid=(n_p // tm,),
            in_specs=[
                pl.BlockSpec((tm, 1), lambda i: (i, 0)),            # node ids
                pl.BlockSpec((tm, num_nodes), lambda i: (i, 0)),    # adjacency tile
                pl.BlockSpec((num_nodes, d_in), lambda i: (0, 0)),  # feat table (resident)
                pl.BlockSpec((d_in, d_out_p), lambda i: (0, 0)),    # w_self   (resident)
                pl.BlockSpec((d_in, d_out_p), lambda i: (0, 0)),    # w_neigh  (resident)
                pl.BlockSpec((1, d_out_p), lambda i: (0, 0)),       # bias     (resident)
            ],
            out_specs=pl.BlockSpec((tm, d_out_p), lambda i: (i, 0)),
        ),
        compiler_params=pltpu.CompilerParams(
            dimension_semantics=("parallel",),   # independent row tiles (v7x: 2 TCs)
        ),
    )(nodes2d, adj_p, feat_table, w_self, w_neigh, b_p)

    return out[:N, :d_out]


def xavier_uniform(key, shape, dtype=jnp.float32):
    fan_in, fan_out = shape
    bound = (6.0 / (fan_in + fan_out)) ** 0.5
    return jax.random.uniform(key, shape, dtype, minval=-bound, maxval=bound)


if __name__ == "__main__":
    key = jax.random.PRNGKey(0)
    k_feat, k_w, k_adj = jax.random.split(key, 3)

    num_nodes = 64      # total nodes in the graph
    batch = 8           # nodes in this forward pass
    input_dim = 32
    output_dim = 32

    # Deterministic synthetic "features" embedding table.
    feat_table = jax.random.normal(k_feat, (num_nodes, input_dim), jnp.float32)

    # Deterministic synthetic adjacency (dense, row-normalized -> mean aggregator).
    adj_logits = jax.random.uniform(k_adj, (batch, num_nodes))
    adj = (adj_logits > 0.8).astype(jnp.float32)
    adj = adj.at[:, 0].set(1.0)  # guarantee at least one neighbor per node
    adj_norm = adj / jnp.sum(adj, axis=1, keepdims=True)

    nodes = jnp.arange(batch, dtype=jnp.int32)

    # Parameters (Xavier-uniform weight, zero bias), self_concat=True.
    w = xavier_uniform(k_w, (2 * input_dim, output_dim))
    b = jnp.zeros((output_dim,), jnp.float32)

    out = combine_forward(nodes, adj_norm, feat_table, w, b)
    out = jax.block_until_ready(out)

    # Reference in plain JAX (same math as the PyTorch module).
    neigh_feats = adj_norm @ feat_table
    self_feats = feat_table[nodes]
    combined = jnp.concatenate([self_feats, neigh_feats], axis=1)
    ref = combined @ w + b
    ref = jnp.where(ref > 0, ref, 0.2 * ref)
    ref = ref / jnp.maximum(
        jnp.sqrt(jnp.sum(ref * ref, axis=-1, keepdims=True)), 1e-12
    )
    assert jnp.allclose(out, ref, atol=2e-5, rtol=2e-5), float(
        jnp.max(jnp.abs(out - ref))
    )

    print("KERNEL_OK")
</pallas_src>

<mosaic_0001>
module attributes {stable_mosaic.version = 11 : i64} {
  func.func @_combine_kernel(%arg0: i32, %arg1: memref<8x1xi32, #tpu.memory_space<vmem>>, %arg2: memref<8x64xf32, #tpu.memory_space<vmem>>, %arg3: memref<64x32xf32, #tpu.memory_space<vmem>>, %arg4: memref<32x128xf32, #tpu.memory_space<vmem>>, %arg5: memref<32x128xf32, #tpu.memory_space<vmem>>, %arg6: memref<1x128xf32, #tpu.memory_space<vmem>>, %arg7: memref<8x128xf32, #tpu.memory_space<vmem>>) attributes {dimension_semantics = [#tpu.dimension_semantics<parallel>], iteration_bounds = array<i64: 1>, scalar_prefetch = 0 : i64, scratch_operands = 0 : i64, tpu.core_type = #tpu.core_type<tc>, window_params = [{transform_indices = @transform_0, window_bounds = array<i64: 8, 1>}, {transform_indices = @transform_1, window_bounds = array<i64: 8, 64>}, {pipeline_mode = #tpu.pipeline_mode<synchronous>, transform_indices = @transform_2, window_bounds = array<i64: 64, 32>}, {pipeline_mode = #tpu.pipeline_mode<synchronous>, transform_indices = @transform_3, window_bounds = array<i64: 32, 128>}, {pipeline_mode = #tpu.pipeline_mode<synchronous>, transform_indices = @transform_4, window_bounds = array<i64: 32, 128>}, {pipeline_mode = #tpu.pipeline_mode<synchronous>, transform_indices = @transform_5, window_bounds = array<i64: 1, 128>}, {transform_indices = @transform_6, window_bounds = array<i64: 8, 128>}]} {
    %c0 = arith.constant 0 : index
    %c0_0 = arith.constant 0 : index
    %0 = vector.load %arg3[%c0, %c0_0] : memref<64x32xf32, #tpu.memory_space<vmem>>, vector<64x32xf32>
    %c0_1 = arith.constant 0 : index
    %c0_2 = arith.constant 0 : index
    %1 = vector.load %arg1[%c0_1, %c0_2] : memref<8x1xi32, #tpu.memory_space<vmem>>, vector<8x1xi32>
    %2 = tpu.iota {dimensions = array<i32: 1>} : vector<8x64xi32>
    %3 = vector.broadcast %1 : vector<8x1xi32> to vector<8x64xi32>
    %4 = arith.cmpi eq, %3, %2 : vector<8x64xi32>
    %5 = arith.extui %4 : vector<8x64xi1> to vector<8x64xi32>
    %6 = arith.sitofp %5 : vector<8x64xi32> to vector<8x64xf32>
    %cst = arith.constant dense<0.000000e+00> : vector<8x32xf32>
    %7 = tpu.matmul %6, %0, %cst {dimension_numbers = #tpu.dot_dimension_numbers<[1], [0], [0], [1], [0, 0, 1, 1], [], []>} : vector<8x64xf32>, vector<64x32xf32>, vector<8x32xf32> -> vector<8x32xf32>
    %c0_3 = arith.constant 0 : index
    %c0_4 = arith.constant 0 : index
    %8 = vector.load %arg2[%c0_3, %c0_4] : memref<8x64xf32, #tpu.memory_space<vmem>>, vector<8x64xf32>
    %cst_5 = arith.constant dense<0.000000e+00> : vector<8x32xf32>
    %9 = tpu.matmul %8, %0, %cst_5 {dimension_numbers = #tpu.dot_dimension_numbers<[1], [0], [0], [1], [0, 0, 1, 1], [], []>} : vector<8x64xf32>, vector<64x32xf32>, vector<8x32xf32> -> vector<8x32xf32>
    %c0_6 = arith.constant 0 : index
    %c0_7 = arith.constant 0 : index
    %10 = vector.load %arg4[%c0_6, %c0_7] : memref<32x128xf32, #tpu.memory_space<vmem>>, vector<32x128xf32>
    %cst_8 = arith.constant dense<0.000000e+00> : vector<8x128xf32>
    %11 = tpu.matmul %7, %10, %cst_8 {dimension_numbers = #tpu.dot_dimension_numbers<[1], [0], [0], [1], [0, 0, 1, 1], [], []>} : vector<8x32xf32>, vector<32x128xf32>, vector<8x128xf32> -> vector<8x128xf32>
    %c0_9 = arith.constant 0 : index
    %c0_10 = arith.constant 0 : index
    %12 = vector.load %arg5[%c0_9, %c0_10] : memref<32x128xf32, #tpu.memory_space<vmem>>, vector<32x128xf32>
    %cst_11 = arith.constant dense<0.000000e+00> : vector<8x128xf32>
    %13 = tpu.matmul %9, %12, %cst_11 {dimension_numbers = #tpu.dot_dimension_numbers<[1], [0], [0], [1], [0, 0, 1, 1], [], []>} : vector<8x32xf32>, vector<32x128xf32>, vector<8x128xf32> -> vector<8x128xf32>
    %14 = arith.addf %11, %13 : vector<8x128xf32>
    %c0_12 = arith.constant 0 : index
    %c0_13 = arith.constant 0 : index
    %15 = vector.load %arg6[%c0_12, %c0_13] : memref<1x128xf32, #tpu.memory_space<vmem>>, vector<1x128xf32>
    %16 = vector.broadcast %15 : vector<1x128xf32> to vector<8x128xf32>
    %17 = arith.addf %14, %16 : vector<8x128xf32>
    %cst_14 = arith.constant 0.000000e+00 : f32
    %18 = vector.broadcast %cst_14 : f32 to vector<8x128xf32>
    %19 = arith.cmpf ogt, %17, %18 : vector<8x128xf32>
    %cst_15 = arith.constant 2.000000e-01 : f32
    %20 = vector.broadcast %cst_15 : f32 to vector<8x128xf32>
    %21 = arith.mulf %20, %17 : vector<8x128xf32>
    %22 = arith.select %19, %17, %21 : vector<8x128xi1>, vector<8x128xf32>
    %23 = arith.mulf %22, %22 : vector<8x128xf32>
    %cst_16 = arith.constant dense<0.000000e+00> : vector<8xf32>
    %24 = vector.multi_reduction <add>, %23, %cst_16 [1] : vector<8x128xf32> to vector<8xf32>
    %25 = vector.shape_cast %24 : vector<8xf32> to vector<8x1xf32>
    %cst_17 = arith.constant 1.000000e-24 : f32
    %26 = vector.broadcast %cst_17 : f32 to vector<8x1xf32>
    %27 = arith.maximumf %25, %26 : vector<8x1xf32>
    %28 = math.rsqrt %27 : vector<8x1xf32>
    %29 = vector.broadcast %28 : vector<8x1xf32> to vector<8x128xf32>
    %30 = arith.mulf %22, %29 : vector<8x128xf32>
    %c0_18 = arith.constant 0 : index
    %c0_19 = arith.constant 0 : index
    %31 = vector.load %arg7[%c0_18, %c0_19] : memref<8x128xf32, #tpu.memory_space<vmem>>, vector<8x128xf32>
    tpu.vector_store %arg7[%c0_18, %c0_19], %30 {strides = array<i32>} : memref<8x128xf32, #tpu.memory_space<vmem>>, vector<8x128xf32>,
    return
  }
  func.func @transform_0(%arg0: i32) -> (i32, i32) {
    %c0_i32 = arith.constant 0 : i32
    %c0_i32_0 = arith.constant 0 : i32
    return %arg0, %c0_i32 : i32, i32
  }
  func.func @transform_1(%arg0: i32) -> (i32, i32) {
    %c0_i32 = arith.constant 0 : i32
    %c0_i32_0 = arith.constant 0 : i32
    return %arg0, %c0_i32 : i32, i32
  }
  func.func @transform_2(%arg0: i32) -> (i32, i32) {
    %c0_i32 = arith.constant 0 : i32
    %c0_i32_0 = arith.constant 0 : i32
    %c0_i32_1 = arith.constant 0 : i32
    return %c0_i32, %c0_i32_0 : i32, i32
  }
  func.func @transform_3(%arg0: i32) -> (i32, i32) {
    %c0_i32 = arith.constant 0 : i32
    %c0_i32_0 = arith.constant 0 : i32
    %c0_i32_1 = arith.constant 0 : i32
    return %c0_i32, %c0_i32_0 : i32, i32
  }
  func.func @transform_4(%arg0: i32) -> (i32, i32) {
    %c0_i32 = arith.constant 0 : i32
    %c0_i32_0 = arith.constant 0 : i32
    %c0_i32_1 = arith.constant 0 : i32
    return %c0_i32, %c0_i32_0 : i32, i32
  }
  func.func @transform_5(%arg0: i32) -> (i32, i32) {
    %c0_i32 = arith.constant 0 : i32
    %c0_i32_0 = arith.constant 0 : i32
    %c0_i32_1 = arith.constant 0 : i32
    return %c0_i32, %c0_i32_0 : i32, i32
  }
  func.func @transform_6(%arg0: i32) -> (i32, i32) {
    %c0_i32 = arith.constant 0 : i32
    %c0_i32_0 = arith.constant 0 : i32
    return %arg0, %c0_i32 : i32, i32
  }
}

</mosaic_0001>

<bundles_post_ra>
// kernel: tpu_custom_call.1
= control target key start
LH: loop header
LB: loop body
LE: loop exit
PB: predicated region body
PF: predicated region fallthrough
CT: control target
= control target key end

     0   :  { %v538_v3 = vmov 0   ;;  %v539_v4 = vmov 0.0|0.0   ;;  %s653_s0 = inlined_call_operand.vmem [shape: s32[8,1], index: 0, kind: input, shape index: {}]   ;;  %s654_s1 = inlined_call_operand.vmem [shape: f32[8,64], index: 1, kind: input, shape index: {}]   ;;  %s655_s2 = inlined_call_operand.vmem [shape: f32[64,32], index: 2, kind: input, shape index: {}]   ;;  %s656_s3 = inlined_call_operand.vmem [shape: f32[32,128], index: 3, kind: input, shape index: {}]   ;;  %s657_s4 = inlined_call_operand.vmem [shape: f32[32,128], index: 4, kind: input, shape index: {}]   ;;  %s658_s5 = inlined_call_operand.vmem [shape: f32[1,128], index: 5, kind: input, shape index: {}]   ;;  %s659_s6 = inlined_call_operand.hbm [shape: f32[8,128], index: 6, kind: output, shape index: {}]  }
   0x1   :  { %v32_v0 = vld [vmem:[%s653_s0] sm:$0xff]  ;;  %v25_v2 = vld [vmem:[%s655_s2 + $0x8] sm:$0xff]  ;;  %511 = vset.pattern.permute.xlu0 %v538_v3  ;;  %482 = vmatprep.subr.bf16.mxu1 %v539_v4  ;;  %v26_v6 = vld [vmem:[%s655_s2 + $0x10] sm:$0xff] }
   0x2   :  { %v24_v1 = vld [vmem:[%s655_s2] sm:$0xff]  ;;  %v27_v7 = vld [vmem:[%s655_s2 + $0x18] sm:$0xff]  ;;  %36 = vperm.xlu0 %511, %v32_v0   ;;  %470 = vmatprep.subr.bf16.mxu0 %v539_v4 }
   0x3   :  { %v471_v5 = vpack.c.bf16 %v25_v2, %v24_v1  ;;  %v474_v8 = vpack.c.bf16 %v27_v7, %v26_v6 }
   0x5   :  { %484 = vmatpush3.bf16.msra.mxu1 %v471_v5  ;;  %472 = vmatpush3.bf16.msra.mxu0 %v471_v5 }
   0x6   :  { %11 = vsyncpa [#allocation3], 0  ;;  %485 = vmatprep.subr.bf16.mxu1 %v539_v4  ;;  %473 = vmatprep.subr.bf16.mxu0 %v539_v4  ;;  %v28_v9 = vld [vmem:[%s655_s2 + $0x20] sm:$0xff]  ;;  %v29_v10 = vld [vmem:[%s655_s2 + $0x28] sm:$0xff]  ;;  %vm540_vm0 = vmmov 0   ;;  %v541_v11 = vmov 0.0   ;;  %v33_v23 = vlaneseq }
   0x7   :  { %445 = vmatprep.mubr.msk.f32.mxu1 %vm540_vm0, %v541_v11  ;;  %426 = vmatprep.mubr.msk.f32.mxu0 %vm540_vm0, %v541_v11  ;;  %v477_v12 = vpack.c.bf16 %v29_v10, %v28_v9  ;;  %v30_v13 = vld [vmem:[%s655_s2 + $0x30] sm:$0xff]  ;;  %v31_v14 = vld [vmem:[%s655_s2 + $0x38] sm:$0xff]  ;;  %v189_v16 = vld [vmem:[%s656_s3] sm:$0xff]  ;;  %vm41_vm1 = vcmask 523264   ;;  %vm197_vm3 = vcmask 261120   ;;  %s542_s30 = smov [#allocation2]  }
   0x8   :  { %v480_v15 = vpack.c.bf16 %v31_v14, %v30_v13  ;;  %v190_v17 = vld [vmem:[%s656_s3 + $0x8] sm:$0xff]  ;;  %v115_v18 = vld [vmem:[%s654_s1] sm:$0xff]  ;;  %v191_v20 = vld [vmem:[%s656_s3 + $0x10] sm:$0xff]  ;;  %v34_v24 = vand.u32 127, %v33_v23  ;;  %s368_s0 = sshll.u32 %s542_s30, 4  ;;  %s369_s0 = int_to_ptr.vmem [resolvable:$true] %s368_s0 }
   0x9   :  { %487 = vmatpush3.bf16.msra.mxu1 %v474_v8  ;;  %475 = vmatpush3.bf16.msra.mxu0 %v474_v8  ;;  %v501_v19 = vpack.c.bf16 %v190_v17, %v189_v16  ;;  %v192_v21 = vld [vmem:[%s656_s3 + $0x18] sm:$0xff]  ;;  %v193_v25 = vld [vmem:[%s657_s4] sm:$0xff]  ;;  %v194_v26 = vld [vmem:[%s657_s4 + $0x8] sm:$0xff]  ;;  %s514_s7 = scalar_lea.vmem %s369_s0, 128  ;;  %p519_p1 = scmp.lt.s32.totalorder %s369_s0, %s369_s0 }
   0xa   :  { %488 = vmatprep.subr.bf16.mxu1 %v539_v4  ;;  %476 = vmatprep.subr.bf16.mxu0 %v539_v4  ;;  %v504_v22 = vpack.c.bf16 %v192_v21, %v191_v20  ;;  %v495_v28 = vpack.c.bf16 %v194_v26, %v193_v25  ;;  %v195_v29 = vld [vmem:[%s657_s4 + $0x10] sm:$0xff]  ;;  %v196_v30 = vld [vmem:[%s657_s4 + $0x18] sm:$0xff]  ;;  %v381_v40 = vld [vmem:[%s658_s5] ss:$0 sm:$0xff]  ;;  %p515_p0 = scmp.ne.s32.totalorder %s369_s0, %s514_s7  ;;  %p520_p2 = scmp.lt.s32.totalorder %s514_s7, %s514_s7 }
   0xb   :  { %v498_v32 = vpack.c.bf16 %v196_v30, %v195_v29 }
   0xc   :  { %p521_p3 = por %p520_p2, %p519_p1 }
   0xd   :  { %490 = vmatpush3.bf16.msra.mxu1 %v477_v12  ;;  %478 = vmatpush3.bf16.msra.mxu0 %v477_v12 }
   0xe   :  { %491 = vmatprep.subr.bf16.mxu1 %v539_v4  ;;  %479 = vmatprep.subr.bf16.mxu0 %v539_v4  ;;  %p522_p4 = pnand %p521_p3, %p515_p0 }
  0x11   :  { %493 = vmatpush3.bf16.msra.mxu1 %v480_v15  ;;  %481 = vmatpush3.bf16.msra.mxu0 %v480_v15 }
  0x12   :  { %494 = vmatprep.subr.bf16.mxu0 %v539_v4  ;;  %500 = vmatprep.subr.bf16.mxu1 %v539_v4 }
  0x14   :  { %446 = vmatmul.mubr.msk.f32.vlgmr.msra.gmra.mrb[0].mxu1 %vm41_vm1, %v115_v18 }
  0x15   :  { %502 = vmatpush3.bf16.msra.mxu1 %v501_v19  ;;  %467 = vmatprep.mubr.msk.f32.mxu1 %vm540_vm0, %v541_v11 }
  0x16   :  { %503 = vmatprep.subr.bf16.mxu1 %v539_v4 }
  0x19   :  { %505 = vmatpush3.bf16.msra.mxu1 %v504_v22 }
  0x81   :  { %v37_v27 = vpop.permute.xlu0 %36 }
  0x82   :  { %vm38_vm2 = vcmp.eq.s32.totalorder %v37_v27, %v34_v24 }
  0x83   :  { %v376_v31 = vsel %vm38_vm2, 1.0, %v541_v11 }
  0x84   :  { %427 = vmatmul.mubr.msk.f32.vlgmr.msra.gmra.mrb[0].mxu0 %vm41_vm1, %v376_v31 }
  0x85   :  { %496 = vmatpush3.bf16.msra.mxu0 %v495_v28  ;;  %456 = vmatprep.mubr.msk.f32.mxu0 %vm540_vm0, %v541_v11 }
  0x86   :  { %497 = vmatprep.subr.bf16.mxu0 %v539_v4 }
  0x89   :  { %499 = vmatpush3.bf16.msra.mxu0 %v498_v32 }
  0xe7   :  { %v185_v33 = vpop.f32.mrb[0].mxu1 }
  0xe8   :  { %v447_v34 = vpop.f32.mrb[1].mxu1  ;;  %457 = vmatmul.mubr.msk.f32.vlgmr.msra.gmra.mrb[2].mxu0 %vm197_vm3, %v185_v33 }
 0x157   :  { %v111_v35 = vpop.f32.mrb[0].mxu0 }
 0x158   :  { %v428_v36 = vpop.f32.mrb[1].mxu0  ;;  %468 = vmatmul.mubr.msk.f32.vlgmr.msra.gmra.mrb[2].mxu1 %vm197_vm3, %v111_v35 }
 0x1bb   :  { %v267_v37 = vpop.f32.mrb[2].mxu0 }
 0x1bc   :  { %v458_v38 = vpop.f32.mrb[3].mxu0 }
 0x22b   :  { %v340_v39 = vpop.f32.mrb[2].mxu1 }
 0x22c   :  { %v341_v41 = vadd.f32 %v340_v39, %v267_v37  ;;  %v469_v42 = vpop.f32.mrb[3].mxu1 }
 0x22e   :  { %v351_v43 = vadd.f32 %v381_v40, %v341_v41 }
 0x230   :  { %vm352_vm4 = vcmp.gt.f32.partialorder %v351_v43, 0.0  ;;  %v353_v44 = vmul.f32 0.2, %v351_v43 }
 0x232   :  { %v354_v45 = vsel %vm352_vm4, %v351_v43, %v353_v44 }
 0x233   :  { %v355_v46 = vmul.f32 %v354_v45, %v354_v45 }
 0x235   :  { %356 = vadd.xlane.f32.xlu0 %v355_v46 }
 0x2c2   :  { %v357_v47 = vpop.xlane.xlu0 %356 }
 0x2c3   :  { %v358_v48 = vmax.f32 %v357_v47, 1e-24 }
 0x2c5   :  { %512 = vrsqrt.f32 %v358_v48 }
 0x2cf   :  { %v513_v49 = vpop.eup %512 }
 0x2d0   :  { %v360_v50 = vmul.f32 %v513_v49, %v354_v45 }
 0x2d2   :  { %361 = vst [vmem:[#allocation2] sm:$0xff] %v360_v50 }
 0x2d3   :  { %525 = shalt.err (!%p522_p4)
}
 0x2d4   :  { %s526_s9 = scalar_lea.hbm %s659_s6, 128 }
 0x2d5   :  { %p527_p5 = scmp.ne.s32.totalorder %s659_s6, %s526_s9  ;;  %p530_p6 = scmp.lt.u32.totalorder %s526_s9, %s659_s6 }
 0x2d7   :  { %p532_p7 = pnand %p530_p6, %p527_p5 }
 0x2d9   :  { %535 = shalt.err (!%p532_p7)
}
 0x2da   :  { %371 = dma.vmem_to_hbm [thread:$0]  %s369_s0, 128, %s659_s6, [#allocation3]  }
 0x2db   :  { %536 = dma.done.wait [#allocation3], 128  }
 0x2dc   :  { %537 = vsyncadd [#allocation3], 4294967168 }
 0x2dd   :  { %375 = vsyncpa [#allocation3], 1 }

</bundles_post_ra>
